<compile_context>
chip_gen: v5e
topology: v5e:2x2
jax: 0.10.0
libtpu: 0.0.40
codegen_flags: <defaults>
</compile_context>

<pallas_src>
import functools

import jax
import jax.numpy as jnp
from jax.experimental import pallas as pl
from jax.experimental.pallas import tpu as pltpu

_LANE = 128
_SUBLANE = 8


def _round_up(x, m):
    return ((x + m - 1) // m) * m


def _head_kernel(x_ref, w_ref, b_ref, labels_ref, logits_ref, nll_ref,
                 *, num_labels, batch, tile_b):
    # x: [TB, H] (activation dtype), w: [H, Lp] (activation dtype),
    # b: [1, Lp] f32, labels: [TB, 1] int32
    # logits: [TB, Lp] (activation dtype), nll: [1, 1] f32 per-tile partial sum
    x = x_ref[...]
    w = w_ref[...]

    # Linear classifier on the MXU (native-dtype inputs, f32 accumulation),
    # lane-dense output columns.
    logits = jnp.dot(x, w, preferred_element_type=jnp.float32) + b_ref[...]
    logits_ref[...] = logits.astype(logits_ref.dtype)

    # Cross-entropy (per-example NLL) on the in-register f32 logits, matching
    # torch.nn.CrossEntropyLoss. Padded label columns are masked out of the
    # softmax normalization; they can never match a real label.
    col = jax.lax.broadcasted_iota(jnp.int32, logits.shape, 1)            # [TB, Lp]
    masked = jnp.where(col < num_labels, logits, -jnp.inf)
    m = jnp.max(masked, axis=-1, keepdims=True)                            # [TB, 1]
    lse = jnp.log(jnp.sum(jnp.exp(masked - m), axis=-1, keepdims=True)) + m

    labels = labels_ref[...]                                               # [TB, 1]
    # Fused "pick the label logit" (no one-hot temporary).
    picked = jnp.sum(jnp.where(col == labels, logits, 0.0),
                     axis=-1, keepdims=True)                               # [TB, 1]
    per_example = lse - picked                                             # [TB, 1]

    # Ragged last tile: rows beyond the real batch contain unspecified data
    # (possibly NaN/Inf); select (not multiply) them to exactly zero before the
    # per-tile partial sum.
    row = (jax.lax.broadcasted_iota(jnp.int32, per_example.shape, 0)
           + pl.program_id(0) * tile_b)
    valid = jnp.where(row < batch, per_example, 0.0)
    nll_ref[...] = jnp.sum(valid, axis=0, keepdims=True)                   # [1, 1]


def sequence_classification_head(pooled_output, weight, bias, labels,
                                 *, tile_b=None, logits_dtype=None):
    """pooled_output: [B, H], weight: [H, L] (transposed from torch's [L, H]),
    bias: [L], labels: [B] int. Returns (loss scalar f32, logits [B, L])."""
    B, H = pooled_output.shape
    L = weight.shape[1]
    if logits_dtype is None:
        logits_dtype = pooled_output.dtype

    # Lane-dense label dimension (only the tiny weight/bias get padded).
    Lp = max(_LANE, _round_up(L, _LANE))

    x_bytes = jnp.dtype(pooled_output.dtype).itemsize
    o_bytes = jnp.dtype(logits_dtype).itemsize
    w_bytes = x_bytes  # weight is cast to the activation dtype for the MXU

    # Per-generation VMEM capacity (64 MiB on v7x, 128 MiB on v5e/v6e).
    try:
        vmem_cap = int(pltpu.get_tpu_info().vmem_capacity_bytes)
    except Exception:
        vmem_cap = 64 * 1024 * 1024  # conservative fallback (v7x per-TC VMEM)

    # Double-buffered streamed tiles (x, logits, labels, nll) + resident
    # weight/bias (still double-buffered by the default pipeline).
    per_row = 2 * (H * x_bytes + Lp * o_bytes + 4)
    resident = 2 * (H * Lp * w_bytes + Lp * 4)

    budget = max(8 * 1024 * 1024, int(vmem_cap * 0.55))
    if tile_b is None:
        tile_b = (budget - resident) // per_row
        tile_b = max(_SUBLANE, min(2048, (tile_b // _SUBLANE) * _SUBLANE))
    # Never larger than the sublane-rounded batch.
    tile_b = min(int(tile_b), max(_SUBLANE, _round_up(B, _SUBLANE)))
    tile_b = max(_SUBLANE, (tile_b // _SUBLANE) * _SUBLANE)
    # Keep >= 2 grid steps when the batch permits so the "parallel" batch axis
    # can be sharded across both TensorCores on v7x.
    if B > 2 * _SUBLANE and -(-B // tile_b) < 2:
        tile_b = max(_SUBLANE, _round_up(-(-B // 2), _SUBLANE))
    num_tiles = -(-B // tile_b)

    # VMEM limit: what we need (with slack), capped with headroom for compiler
    # scratch on the 64 MiB v7x VMEM.
    needed = resident + per_row * tile_b + 4 * num_tiles + (1 << 20)
    vmem_limit = int(min(max(int(needed * 1.5), 32 * 1024 * 1024),
                         int(vmem_cap * 0.85)))

    # Host-side prep: only the tiny classifier params are padded; the dominant
    # pooled_output stream is passed through untouched (no pad, no upcast).
    w = jnp.pad(weight.astype(pooled_output.dtype), ((0, 0), (0, Lp - L)))
    b2 = jnp.pad(bias.astype(jnp.float32).reshape(1, L), ((0, 0), (0, Lp - L)))
    lab = labels.astype(jnp.int32).reshape(B, 1)

    kernel = functools.partial(
        _head_kernel, num_labels=L, batch=B, tile_b=tile_b)

    logits_p, nll = pl.pallas_call(
        kernel,
        out_shape=(
            jax.ShapeDtypeStruct((B, Lp), logits_dtype),
            jax.ShapeDtypeStruct((num_tiles, 1), jnp.float32),
        ),
        grid=(num_tiles,),
        in_specs=[
            pl.BlockSpec((tile_b, H), lambda i: (i, 0)),   # pooled_output tile
            pl.BlockSpec((H, Lp), lambda i: (0, 0)),       # weight (resident)
            pl.BlockSpec((1, Lp), lambda i: (0, 0)),       # bias (resident)
            pl.BlockSpec((tile_b, 1), lambda i: (i, 0)),   # labels tile
        ],
        out_specs=(
            pl.BlockSpec((tile_b, Lp), lambda i: (i, 0)),  # logits tile
            pl.BlockSpec((1, 1), lambda i: (i, 0)),        # per-tile NLL sum
        ),
        compiler_params=pltpu.CompilerParams(
            dimension_semantics=("parallel",),
            vmem_limit_bytes=vmem_limit,
        ),
        cost_estimate=pl.CostEstimate(
            flops=2 * B * H * Lp,
            transcendentals=B * Lp,
            bytes_accessed=(B * H * x_bytes + H * Lp * w_bytes
                            + B * Lp * o_bytes + B * 4 + Lp * 4
                            + num_tiles * 4),
        ),
    )(pooled_output, w, b2, lab)

    logits = logits_p[:, :L]
    loss = jnp.sum(nll) / B   # mean over real rows (padded rows summed as 0)
    return loss, logits


if __name__ == "__main__":
    # Small, deterministic synthetic setup. batch=6 is deliberately not a
    # multiple of 8 to exercise the ragged-tile / in-kernel masking path
    # (no host-side padding of pooled_output anymore).
    batch = 6
    hidden_size = 32
    num_labels = 4

    key = jax.random.PRNGKey(0)
    k_x, k_w, k_b, k_y = jax.random.split(key, 4)

    pooled_output = jax.random.normal(k_x, (batch, hidden_size), dtype=jnp.float32)
    # nn.Linear(hidden_size, num_labels): weight is [L, H] in torch; stored [H, L] here.
    weight = (jax.random.normal(k_w, (hidden_size, num_labels), dtype=jnp.float32)
              * (1.0 / jnp.sqrt(hidden_size)))
    bias = jax.random.normal(k_b, (num_labels,), dtype=jnp.float32) * 0.01
    labels = jax.random.randint(k_y, (batch,), 0, num_labels, dtype=jnp.int32)

    loss, logits = sequence_classification_head(pooled_output, weight, bias, labels)
    jax.block_until_ready((loss, logits))

    # Pure-JAX reference check.
    ref_logits = pooled_output @ weight + bias
    ref_lse = jax.scipy.special.logsumexp(ref_logits, axis=-1)
    ref_loss = jnp.mean(ref_lse - ref_logits[jnp.arange(batch), labels])
    assert logits.shape == (batch, num_labels)
    assert jnp.allclose(logits, ref_logits, atol=1e-5, rtol=1e-5)
    assert jnp.allclose(loss, ref_loss, atol=1e-5, rtol=1e-5)

    print("KERNEL_OK")
</pallas_src>

<mosaic_0001>
module attributes {stable_mosaic.version = 11 : i64} {
  func.func @_head_kernel(%arg0: i32, %arg1: memref<8x32xf32, #tpu.memory_space<vmem>>, %arg2: memref<32x128xf32, #tpu.memory_space<vmem>>, %arg3: memref<1x128xf32, #tpu.memory_space<vmem>>, %arg4: memref<8x1xi32, #tpu.memory_space<vmem>>, %arg5: memref<8x128xf32, #tpu.memory_space<vmem>>, %arg6: memref<1x1xf32, #tpu.memory_space<vmem>>) attributes {dimension_semantics = [#tpu.dimension_semantics<parallel>], iteration_bounds = array<i64: 1>, scalar_prefetch = 0 : i64, scratch_operands = 0 : i64, tpu.core_type = #tpu.core_type<tc>, window_params = [{transform_indices = @transform_0, window_bounds = array<i64: 8, 32>}, {pipeline_mode = #tpu.pipeline_mode<synchronous>, transform_indices = @transform_1, window_bounds = array<i64: 32, 128>}, {pipeline_mode = #tpu.pipeline_mode<synchronous>, transform_indices = @transform_2, window_bounds = array<i64: 1, 128>}, {transform_indices = @transform_3, window_bounds = array<i64: 8, 1>}, {transform_indices = @transform_4, window_bounds = array<i64: 8, 128>}, {transform_indices = @transform_5, window_bounds = array<i64: 1, 1>}]} {
    %c0 = arith.constant 0 : index
    %c0_0 = arith.constant 0 : index
    %0 = vector.load %arg1[%c0, %c0_0] : memref<8x32xf32, #tpu.memory_space<vmem>>, vector<8x32xf32>
    %c0_1 = arith.constant 0 : index
    %c0_2 = arith.constant 0 : index
    %1 = vector.load %arg2[%c0_1, %c0_2] : memref<32x128xf32, #tpu.memory_space<vmem>>, vector<32x128xf32>
    %cst = arith.constant dense<0.000000e+00> : vector<8x128xf32>
    %2 = tpu.matmul %0, %1, %cst {dimension_numbers = #tpu.dot_dimension_numbers<[1], [0], [0], [1], [0, 0, 1, 1], [], []>} : vector<8x32xf32>, vector<32x128xf32>, vector<8x128xf32> -> vector<8x128xf32>
    %c0_3 = arith.constant 0 : index
    %c0_4 = arith.constant 0 : index
    %3 = vector.load %arg3[%c0_3, %c0_4] : memref<1x128xf32, #tpu.memory_space<vmem>>, vector<1x128xf32>
    %4 = vector.broadcast %3 : vector<1x128xf32> to vector<8x128xf32>
    %5 = arith.addf %2, %4 : vector<8x128xf32>
    %c0_5 = arith.constant 0 : index
    %c0_6 = arith.constant 0 : index
    %6 = vector.load %arg5[%c0_5, %c0_6] : memref<8x128xf32, #tpu.memory_space<vmem>>, vector<8x128xf32>
    tpu.vector_store %arg5[%c0_5, %c0_6], %5 {strides = array<i32>} : memref<8x128xf32, #tpu.memory_space<vmem>>, vector<8x128xf32>,
    %7 = tpu.iota {dimensions = array<i32: 1>} : vector<8x128xi32>
    %c4_i32 = arith.constant 4 : i32
    %8 = vector.broadcast %c4_i32 : i32 to vector<8x128xi32>
    %9 = arith.cmpi slt, %7, %8 : vector<8x128xi32>
    %cst_7 = arith.constant 0xFF800000 : f32
    %10 = vector.broadcast %cst_7 : f32 to vector<8x128xf32>
    %11 = arith.select %9, %5, %10 : vector<8x128xi1>, vector<8x128xf32>
    %cst_8 = arith.constant dense<0xFF800000> : vector<8xf32>
    %12 = vector.multi_reduction <maximumf>, %11, %cst_8 [1] : vector<8x128xf32> to vector<8xf32>
    %13 = vector.shape_cast %12 : vector<8xf32> to vector<8x1xf32>
    %14 = vector.broadcast %13 : vector<8x1xf32> to vector<8x128xf32>
    %15 = arith.subf %11, %14 : vector<8x128xf32>
    %16 = math.exp %15 : vector<8x128xf32>
    %cst_9 = arith.constant dense<0.000000e+00> : vector<8xf32>
    %17 = vector.multi_reduction <add>, %16, %cst_9 [1] : vector<8x128xf32> to vector<8xf32>
    %18 = vector.shape_cast %17 : vector<8xf32> to vector<8x1xf32>
    %19 = math.log %18 : vector<8x1xf32>
    %20 = arith.addf %19, %13 : vector<8x1xf32>
    %c0_10 = arith.constant 0 : index
    %c0_11 = arith.constant 0 : index
    %21 = vector.load %arg4[%c0_10, %c0_11] : memref<8x1xi32, #tpu.memory_space<vmem>>, vector<8x1xi32>
    %22 = vector.broadcast %21 : vector<8x1xi32> to vector<8x128xi32>
    %23 = arith.cmpi eq, %7, %22 : vector<8x128xi32>
    %cst_12 = arith.constant 0.000000e+00 : f32
    %24 = vector.broadcast %cst_12 : f32 to vector<8x128xf32>
    %25 = arith.select %23, %5, %24 : vector<8x128xi1>, vector<8x128xf32>
    %cst_13 = arith.constant dense<0.000000e+00> : vector<8xf32>
    %26 = vector.multi_reduction <add>, %25, %cst_13 [1] : vector<8x128xf32> to vector<8xf32>
    %27 = vector.shape_cast %26 : vector<8xf32> to vector<8x1xf32>
    %28 = arith.subf %20, %27 : vector<8x1xf32>
    %29 = tpu.iota {dimensions = array<i32: 0>} : vector<8x1xi32>
    %c8_i32 = arith.constant 8 : i32
    %30 = arith.muli %arg0, %c8_i32 : i32
    %31 = vector.broadcast %30 : i32 to vector<8x1xi32>
    %32 = arith.addi %29, %31 : vector<8x1xi32>
    %c6_i32 = arith.constant 6 : i32
    %33 = vector.broadcast %c6_i32 : i32 to vector<8x1xi32>
    %34 = arith.cmpi slt, %32, %33 : vector<8x1xi32>
    %cst_14 = arith.constant 0.000000e+00 : f32
    %35 = vector.broadcast %cst_14 : f32 to vector<8x1xf32>
    %36 = arith.select %34, %28, %35 : vector<8x1xi1>, vector<8x1xf32>
    %cst_15 = arith.constant dense<0.000000e+00> : vector<1xf32>
    %37 = vector.multi_reduction <add>, %36, %cst_15 [0] : vector<8x1xf32> to vector<1xf32>
    %38 = vector.shape_cast %37 : vector<1xf32> to vector<1x1xf32>
    %c0_16 = arith.constant 0 : index
    %c0_17 = arith.constant 0 : index
    %39 = vector.load %arg6[%c0_16, %c0_17] : memref<1x1xf32, #tpu.memory_space<vmem>>, vector<1x1xf32>
    tpu.vector_store %arg6[%c0_16, %c0_17], %38 {strides = array<i32>} : memref<1x1xf32, #tpu.memory_space<vmem>>, vector<1x1xf32>,
    return
  }
  func.func @transform_0(%arg0: i32) -> (i32, i32) {
    %c0_i32 = arith.constant 0 : i32
    %c0_i32_0 = arith.constant 0 : i32
    return %arg0, %c0_i32 : i32, i32
  }
  func.func @transform_1(%arg0: i32) -> (i32, i32) {
    %c0_i32 = arith.constant 0 : i32
    %c0_i32_0 = arith.constant 0 : i32
    %c0_i32_1 = arith.constant 0 : i32
    return %c0_i32, %c0_i32_0 : i32, i32
  }
  func.func @transform_2(%arg0: i32) -> (i32, i32) {
    %c0_i32 = arith.constant 0 : i32
    %c0_i32_0 = arith.constant 0 : i32
    %c0_i32_1 = arith.constant 0 : i32
    return %c0_i32, %c0_i32_0 : i32, i32
  }
  func.func @transform_3(%arg0: i32) -> (i32, i32) {
    %c0_i32 = arith.constant 0 : i32
    %c0_i32_0 = arith.constant 0 : i32
    return %arg0, %c0_i32 : i32, i32
  }
  func.func @transform_4(%arg0: i32) -> (i32, i32) {
    %c0_i32 = arith.constant 0 : i32
    %c0_i32_0 = arith.constant 0 : i32
    return %arg0, %c0_i32 : i32, i32
  }
  func.func @transform_5(%arg0: i32) -> (i32, i32) {
    %c0_i32 = arith.constant 0 : i32
    %c0_i32_0 = arith.constant 0 : i32
    return %arg0, %c0_i32 : i32, i32
  }
}

</mosaic_0001>

<bundles_post_ra>
// kernel: tpu_custom_call.1
= control target key start
LH: loop header
LB: loop body
LE: loop exit
PB: predicated region body
PF: predicated region fallthrough
CT: control target
= control target key end

     0   :  { %11 = vsyncpa [#allocation3], 0  ;;  %s287_s0 = inlined_call_operand.vmem [shape: f32[6,32], index: 0, kind: input, shape index: {}]   ;;  %s288_s1 = inlined_call_operand.hbm [shape: f32[32,128], index: 1, kind: input, shape index: {}]   ;;  %s289_s2 = inlined_call_operand.vmem [shape: f32[1,128], index: 2, kind: input, shape index: {}]   ;;  %s290_s3 = inlined_call_operand.vmem [shape: s32[6,1], index: 3, kind: input, shape index: {}]   ;;  %s291_s4 = inlined_call_operand.hbm [shape: f32[6,128], index: 4, kind: output, shape index: {0}]   ;;  %s292_s5 = inlined_call_operand.hbm [shape: f32[1,1], index: 5, kind: output, shape index: {1}]  }
   0x1   :  { %12 = vsyncpa [#allocation4], 0 }
   0x2   :  { %13 = vsyncpa [#allocation7], 0  ;;  %s20_s20 = sshll.u32 %s288_s1, 4  ;;  %s233_s21 = smov [#allocation2]   ;;  %s21_s20 = int_to_ptr.hbm [resolvable:$true] %s20_s20 }
   0x3   :  { %s22_s22 = sshll.u32 %s233_s21, 4  ;;  %s234_s23 = smov 128   ;;  %s23_s22 = int_to_ptr.vmem [resolvable:$true] %s22_s22 }
   0x4   :  { %s235_s24 = smov 8  }
   0x5   :  { %28 = dma.hbm_to_vmem [thread:$0]  %s21_s20, 512, %s23_s22, [#allocation3], %s234_s23, %s234_s23, %s235_s24  }
   0x6   :  { %227 = dma.done.wait [#allocation3], 512  }
   0x7   :  { %228 = vsyncadd [#allocation3], 4294966784  ;;  %v41_v0 = vld [vmem:[#allocation2 + $0x18] sm:$0xff]  ;;  %v40_v1 = vld [vmem:[#allocation2 + $0x10] sm:$0xff]  ;;  %vm46_vm0 = vcmask 261120   ;;  %v236_v5 = vmov 0   ;;  %v71_v6 = vlaneseq }
   0x8   :  { %62 = vmatpush.msra.mxu0 %v41_v0  ;;  %v39_v2 = vld [vmem:[#allocation2 + $0x8] sm:$0xff]  ;;  %v38_v3 = vld [vmem:[#allocation2] sm:$0xff]  ;;  %149 = vset.pattern.permute.xlu0 %v236_v5  ;;  %s116_s30 = sshll.u32 %s291_s4, 4  ;;  %s237_s6 = smov [#allocation5]   ;;  %vm107_vm4 = vcmask 0   ;;  %s117_s30 = int_to_ptr.hbm [resolvable:$true] %s116_s30 }
   0x9   :  { %v37_v4 = vld [vmem:[%s287_s0] sm:$0xff]  ;;  %v72_v7 = vand.u32 127, %v71_v6  ;;  %s114_s7 = sshll.u32 %s237_s6, 4  ;;  %v95_v21 = vshrl.u32 %v71_v6, 7  ;;  %s127_s10 = sshll.u32 %s292_s5, 4  ;;  %s115_s7 = int_to_ptr.vmem [resolvable:$true] %s114_s7  ;;  %s128_s10 = int_to_ptr.hbm [resolvable:$true] %s127_s10 }
   0xa   :  { %63 = vmatpush.msra.mxu0 %v40_v1  ;;  %v150_v8 = vld [vmem:[%s289_s2] ss:$0 sm:$0xff] }
   0xb   :  { %vm73_vm1 = vcmp.lt.s32.totalorder %v72_v7, 4  ;;  %v85_v12 = vld [vmem:[%s290_s3] sm:$0xff]  ;;  %vm99_vm3 = vcmp.lt.s32.totalorder %v95_v21, 6  ;;  %s238_s3 = smov [#allocation6]  }
   0xc   :  { %64 = vmatpush.msra.mxu0 %v39_v2  ;;  %s125_s4 = sshll.u32 %s238_s3, 4  ;;  %s126_s4 = int_to_ptr.vmem [resolvable:$true] %s125_s4 }
   0xe   :  { %65 = vmatpush.msra.mxu0 %v38_v3 }
   0xf   :  { %142 = vmatmul.msk.f32.vlgmr.msra.gmra.mxu0 %vm46_vm0, %v37_v4 }
  0x8c   :  { %v67_v9 = vpop.f32.mrf.mxu0 }
  0x8d   :  { %v68_v10 = vadd.f32 %v150_v8, %v67_v9 }
  0x8f   :  { %70 = vst [vmem:[#allocation5] sm:$0xff] %v68_v10  ;;  %v74_v11 = vsel %vm73_vm1, %v68_v10, -inf }
  0x90   :  { %75 = vmax.xlane.f32.xlu0 %v74_v11  ;;  %119 = dma.vmem_to_hbm [thread:$0]  %s115_s7, 128, %s117_s30, [#allocation4]  }
  0xa4   :  { %87 = vperm.xlu0 %149, %v85_v12  }
 0x103   :  { %v76_v13 = vpop.xlane.xlu0 %75 }
 0x104   :  { %v77_v14 = vsub.f32 %v74_v11, %v76_v13 }
 0x106   :  { %v78_v15 = vmul.f32 1.442695, %v77_v14 }
 0x108   :  { %151 = vpow2.f32 %v78_v15 }
 0x10e   :  { %v152_v16 = vpop.eup %151 }
 0x10f   :  { %80 = vadd.xlane.f32.xlu1 %v152_v16 }
 0x116   :  { %v88_v17 = vpop.permute.xlu0 %87 }
 0x117   :  { %vm89_vm2 = vcmp.eq.s32.totalorder %v72_v7, %v88_v17 }
 0x118   :  { %v90_v18 = vsel %vm89_vm2, %v68_v10, 0.0 }
 0x119   :  { %91 = vadd.xlane.f32.xlu1 %v90_v18 }
 0x182   :  { %v81_v19 = vpop.xlane.xlu1 %80 }
 0x183   :  { %153 = vlog2.f32 %v81_v19 }
 0x189   :  { %v154_v20 = vpop.eup %153 }
 0x18a   :  { %v83_v22 = vmul.f32 0.6931472, %v154_v20 }
 0x18c   :  { %v84_v23 = vadd.f32 %v83_v22, %v76_v13  ;;  %v92_v24 = vpop.xlane.xlu1 %91 }
 0x18e   :  { %v93_v25 = vsub.f32 %v84_v23, %v92_v24 }
 0x190   :  { %v100_v26 = vsel %vm99_vm3, %v93_v25, 0.0 }
 0x191   :  { %v101_v27 = vrot.slane %v100_v26, 4 }
 0x193   :  { %v102_v28 = vadd.f32 %v101_v27, %v100_v26 }
 0x195   :  { %v103_v29 = vrot.slane %v102_v28, 2 }
 0x197   :  { %v104_v30 = vadd.f32 %v103_v29, %v102_v28 }
 0x199   :  { %v105_v31 = vrot.slane %v104_v30, 1 }
 0x19b   :  { %v106_v32 = vadd.f32 %v105_v31, %v104_v30 }
 0x19d   :  { %108 = vst.msk [vmem:[#allocation6] sm:$0x1] %vm107_vm4, %v106_v32 }
 0x19e   :  { %130 = dma.vmem_to_hbm [thread:$0]  %s126_s4, 16, %s128_s10, [#allocation7]  }
 0x19f   :  { %229 = dma.done.wait [#allocation4], 128  }
 0x1a0   :  { %230 = vsyncadd [#allocation4], 4294967168 }
 0x1a1   :  { %231 = dma.done.wait [#allocation7], 16  }
 0x1a2   :  { %232 = vsyncadd [#allocation7], 4294967280 }
 0x1a3   :  { %139 = vsyncpa [#allocation3], 1 }
 0x1a4   :  { %140 = vsyncpa [#allocation4], 1 }
 0x1a5   :  { %141 = vsyncpa [#allocation7], 1 }

</bundles_post_ra>
